<compile_context>
chip_gen: v5e
topology: v5e:2x2
jax: 0.10.0
libtpu: 0.0.40
codegen_flags: <defaults>
</compile_context>

<pallas_src>
import jax
import jax.numpy as jnp
from jax.experimental import pallas as pl
from jax.experimental.pallas import tpu as pltpu

F1 = 2048                     # width of x1 from cat_net
F2 = 1633                     # width of x2 from cat_net
F_IN = F1 + F2                # 3681, Linear fan-in
N_CLASSES = 10
LANE = 128
F2_PAD = ((F2 + LANE - 1) // LANE) * LANE   # 1664 = 13 * 128 (zero-padded lanes)


def _round_up(x, m):
    return ((x + m - 1) // m) * m


def _tpu_gen_config():
    """(target_tb, vmem_limit_bytes, tensorcores_per_chip) per TPU generation.

    The kernel is HBM-bandwidth bound (~10 FLOP/byte), so the tile only has to
    be big enough to amortize the ~0.35 us per-grid-step pipeline overhead
    while fitting the double-buffered input tiles in scoped VMEM.
    """
    try:
        kind = jax.devices()[0].device_kind.lower()
    except Exception:
        kind = ""
    if "v6" in kind:                         # v6e: 128 MiB VMEM, 1 TC
        return 2048, 96 * 1024 * 1024, 1
    if "v5" in kind:                         # v5e/v5p: 128 MiB VMEM, 1 TC
        return 1024, 48 * 1024 * 1024, 1
    if "7" in kind:                          # v7x: 64 MiB VMEM per TC, 2 TCs
        return 1024, 40 * 1024 * 1024, 2
    return 1024, 40 * 1024 * 1024, 2         # unknown: v7x-safe defaults


def nima_head_kernel(x1_ref, x2_ref, w1_ref, w2_ref, b_ref, o_ref):
    """ReLU -> (Dropout = identity in eval) -> Linear(3681,10) -> Softmax(dim=1).

    x1_ref: (TB, 2048)    bf16 features (first cat_net output)
    x2_ref: (TB, F2x)     bf16 features (second cat_net output; if lane-padded,
                          lanes >= 1633 are zero)
    w1_ref: (2048, 10)    bf16, head weight rows [:2048]
    w2_ref: (F2x, 10)     bf16, head weight rows [2048:], pad rows zero
    b_ref : (1, 10)       f32 bias
    o_ref : (TB, 10)      f32 softmax probabilities
    """
    # ReLU written back in place into the input VMEM tiles -- avoids a second
    # full-size bf16 temporary per tile (VMEM-budget enabler for large TB).
    x1_ref[...] = jnp.maximum(x1_ref[...], 0.0)
    x2_ref[...] = jnp.maximum(x2_ref[...], 0.0)
    # nn.Dropout(p=0.75) is the identity at inference time (module is frozen).
    # concat([x1, x2], 1) @ W  ==  x1 @ W[:2048] + x2 @ W[2048:]  (concat fused away).
    logits = (jnp.dot(x1_ref[...], w1_ref[...], preferred_element_type=jnp.float32)
              + jnp.dot(x2_ref[...], w2_ref[...], preferred_element_type=jnp.float32)
              + b_ref[...])
    m = jnp.max(logits, axis=-1, keepdims=True)   # numerically stable softmax
    e = jnp.exp(logits - m)
    s = jnp.sum(e, axis=-1, keepdims=True)
    o_ref[...] = (e / s).astype(o_ref.dtype)      # exact division (hidden under DMA)


def nima_head(x1, x2, w1h, w2h, b2, *, target_tb=None, vmem_limit_bytes=None):
    """x1: (B, 2048) bf16; x2: (B, 1664) or (B, 1633) bf16 (no wrapper-side pad).

    The weight rows must already match x2's width (prepare_head_params).
    """
    B, f1 = x1.shape
    f2 = x2.shape[1]
    assert f1 == w1h.shape[0], "x1 width / head weight split mismatch"
    assert f2 == w2h.shape[0], ("x2 width must match pre-split head weights; "
                                "no padding pass is done in the wrapper")

    gen_tb, gen_vmem, num_tc = _tpu_gen_config()
    target_tb = gen_tb if target_tb is None else target_tb
    vmem_limit_bytes = gen_vmem if vmem_limit_bytes is None else vmem_limit_bytes

    if num_tc > 1 and B > 8:
        # Keep >= 1 tile per TensorCore so the 'parallel' axis feeds both TCs (v7x).
        tb = min(target_tb, _round_up(pl.cdiv(B, num_tc), 8))
    else:
        tb = min(target_tb, B)          # tb == B (full dim) or a multiple of 8
    grid = (pl.cdiv(B, tb),)

    return pl.pallas_call(
        nima_head_kernel,
        out_shape=jax.ShapeDtypeStruct((B, N_CLASSES), jnp.float32),
        grid_spec=pltpu.PrefetchScalarGridSpec(
            num_scalar_prefetch=0,
            grid=grid,
            in_specs=[
                pl.BlockSpec((tb, f1), lambda i: (i, 0)),          # x1 tile
                pl.BlockSpec((tb, f2), lambda i: (i, 0)),          # x2 tile
                pl.BlockSpec((f1, N_CLASSES), lambda i: (0, 0)),   # resident weights
                pl.BlockSpec((f2, N_CLASSES), lambda i: (0, 0)),
                pl.BlockSpec((1, N_CLASSES), lambda i: (0, 0)),    # resident bias
            ],
            out_specs=pl.BlockSpec((tb, N_CLASSES), lambda i: (i, 0)),
        ),
        compiler_params=pltpu.CompilerParams(
            dimension_semantics=("parallel",),        # shard batch tiles across TCs
            vmem_limit_bytes=vmem_limit_bytes,        # sized per generation above
        ),
    )(x1, x2, w1h, w2h, b2)


def prepare_head_params(head_w, head_b, *, x2_width=F2_PAD, dtype=jnp.bfloat16):
    """Split / (optionally lane-pad) the Linear(3681,10) params ONCE, offline.

    x2_width: width of x2 as emitted by the producer: 1664 if the backbone already
    lane-pads to a multiple of 128 (preferred, no extra HBM pass), 1633 for the
    raw torch width (full-extent BlockSpec path).
    """
    assert x2_width >= F2
    w1h = head_w[:F1, :].astype(dtype)                                   # (2048, 10)
    w2h = (jnp.zeros((x2_width, N_CLASSES), dtype)
           .at[:F2, :].set(head_w[F1:, :].astype(dtype)))                # (x2_width, 10)
    b2 = head_b.reshape(1, N_CLASSES).astype(jnp.float32)
    return w1h, w2h, b2


def cat_net_standin(x_nchw, w1, w2p):
    # TODO(synk): the real cat_net backbone (ResNeXt-based, defined elsewhere in
    # ReLIC) is not part of the given source; a deterministic projection stand-in
    # producing the same output widths (2048, 1633 + zero lane-pad to 1664) is used.
    B = x_nchw.shape[0]
    x_flat = x_nchw.reshape(B, -1)
    x1 = jnp.tanh(x_flat @ w1).astype(jnp.bfloat16)     # (B, 2048)
    x2 = jnp.tanh(x_flat @ w2p).astype(jnp.bfloat16)    # (B, 1664); lanes >=1633 are 0
    return x1, x2


def nima_forward(x_nchw, params):
    x1, x2 = cat_net_standin(x_nchw, params["w1"], params["w2"])
    # torch.cat([x1, x2], 1) + head are fused into the Pallas kernel (two partial dots).
    return nima_head(x1, x2, params["head_w1"], params["head_w2"], params["head_b2"])


if __name__ == "__main__":
    key = jax.random.PRNGKey(0)
    k_x, k_w1, k_w2, k_hw, k_hb = jax.random.split(key, 5)

    B, C, H, W = 2, 3, 16, 16
    x = jax.random.normal(k_x, (B, C, H, W), jnp.float32)   # NCHW, like PyTorch

    d_flat = C * H * W
    # Stand-in backbone projections -> feature widths 2048 + 1633 (x2 lane-padded to
    # 1664 via zero weight columns, so there is NO separate pad pass over activations).
    w1 = 0.02 * jax.random.normal(k_w1, (d_flat, F1), jnp.float32)
    w2 = 0.02 * jax.random.normal(k_w2, (d_flat, F2), jnp.float32)
    w2p = jnp.zeros((d_flat, F2_PAD), jnp.float32).at[:, :F2].set(w2)

    # nn.Linear(3681, 10) default init: U(-1/sqrt(fan_in), 1/sqrt(fan_in))
    head_w = jax.random.uniform(k_hw, (F_IN, N_CLASSES), jnp.float32,
                                minval=-1.0 / jnp.sqrt(float(F_IN)),
                                maxval=1.0 / jnp.sqrt(float(F_IN)))
    head_b = jax.random.uniform(k_hb, (N_CLASSES,), jnp.float32,
                                minval=-1.0 / jnp.sqrt(float(F_IN)),
                                maxval=1.0 / jnp.sqrt(float(F_IN)))

    head_w1, head_w2, head_b2 = prepare_head_params(head_w, head_b, x2_width=F2_PAD)
    params = {"w1": w1, "w2": w2p,
              "head_w1": head_w1, "head_w2": head_w2, "head_b2": head_b2}

    out = jax.block_until_ready(nima_forward(x, params))
    assert out.shape == (B, N_CLASSES)

    # Pure-JAX reference with the same bf16 inputs/weights, f32 math.
    # (bf16 activations/weights are an intentional precision tradeoff vs the
    #  PyTorch f32 module; the reference below uses the same bf16 values.)
    x1r, x2r = cat_net_standin(x, params["w1"], params["w2"])
    xc = jnp.concatenate([x1r.astype(jnp.float32),
                          x2r[:, :F2].astype(jnp.float32)], axis=1)
    w_ref = jnp.concatenate([head_w1.astype(jnp.float32),
                             head_w2[:F2].astype(jnp.float32)], axis=0)
    logits_ref = jnp.maximum(xc, 0.0) @ w_ref + head_b2
    ref = jax.nn.softmax(logits_ref, axis=1)

    assert jnp.allclose(jnp.sum(out, axis=1), 1.0, atol=1e-5)
    assert jnp.allclose(out, ref, atol=1e-3)
    print("KERNEL_OK")
</pallas_src>

<mosaic_0001>
module attributes {stable_mosaic.version = 11 : i64} {
  func.func @nima_head_kernel(%arg0: i32, %arg1: memref<2x2048xbf16, #tpu.memory_space<vmem>>, %arg2: memref<2x1664xbf16, #tpu.memory_space<vmem>>, %arg3: memref<2048x10xbf16, #tpu.memory_space<vmem>>, %arg4: memref<1664x10xbf16, #tpu.memory_space<vmem>>, %arg5: memref<1x10xf32, #tpu.memory_space<vmem>>, %arg6: memref<2x10xf32, #tpu.memory_space<vmem>>) attributes {dimension_semantics = [#tpu.dimension_semantics<parallel>], iteration_bounds = array<i64: 1>, scalar_prefetch = 0 : i64, scratch_operands = 0 : i64, tpu.core_type = #tpu.core_type<tc>, window_params = [{transform_indices = @transform_0, window_bounds = array<i64: 2, 2048>}, {transform_indices = @transform_1, window_bounds = array<i64: 2, 1664>}, {pipeline_mode = #tpu.pipeline_mode<synchronous>, transform_indices = @transform_2, window_bounds = array<i64: 2048, 10>}, {pipeline_mode = #tpu.pipeline_mode<synchronous>, transform_indices = @transform_3, window_bounds = array<i64: 1664, 10>}, {pipeline_mode = #tpu.pipeline_mode<synchronous>, transform_indices = @transform_4, window_bounds = array<i64: 1, 10>}, {transform_indices = @transform_5, window_bounds = array<i64: 2, 10>}]} {
    %c0 = arith.constant 0 : index
    %c0_0 = arith.constant 0 : index
    %0 = vector.load %arg1[%c0, %c0_0] : memref<2x2048xbf16, #tpu.memory_space<vmem>>, vector<2x2048xbf16>
    %cst = arith.constant 0.000000e+00 : bf16
    %1 = vector.broadcast %cst : bf16 to vector<2x2048xbf16>
    %2 = arith.maximumf %0, %1 : vector<2x2048xbf16>
    %c0_1 = arith.constant 0 : index
    %c0_2 = arith.constant 0 : index
    %3 = vector.load %arg1[%c0_1, %c0_2] : memref<2x2048xbf16, #tpu.memory_space<vmem>>, vector<2x2048xbf16>
    tpu.vector_store %arg1[%c0_1, %c0_2], %2 {strides = array<i32>} : memref<2x2048xbf16, #tpu.memory_space<vmem>>, vector<2x2048xbf16>,
    %c0_3 = arith.constant 0 : index
    %c0_4 = arith.constant 0 : index
    %4 = vector.load %arg2[%c0_3, %c0_4] : memref<2x1664xbf16, #tpu.memory_space<vmem>>, vector<2x1664xbf16>
    %cst_5 = arith.constant 0.000000e+00 : bf16
    %5 = vector.broadcast %cst_5 : bf16 to vector<2x1664xbf16>
    %6 = arith.maximumf %4, %5 : vector<2x1664xbf16>
    %c0_6 = arith.constant 0 : index
    %c0_7 = arith.constant 0 : index
    %7 = vector.load %arg2[%c0_6, %c0_7] : memref<2x1664xbf16, #tpu.memory_space<vmem>>, vector<2x1664xbf16>
    tpu.vector_store %arg2[%c0_6, %c0_7], %6 {strides = array<i32>} : memref<2x1664xbf16, #tpu.memory_space<vmem>>, vector<2x1664xbf16>,
    %c0_8 = arith.constant 0 : index
    %c0_9 = arith.constant 0 : index
    %8 = vector.load %arg1[%c0_8, %c0_9] : memref<2x2048xbf16, #tpu.memory_space<vmem>>, vector<2x2048xbf16>
    %c0_10 = arith.constant 0 : index
    %c0_11 = arith.constant 0 : index
    %9 = vector.load %arg3[%c0_10, %c0_11] : memref<2048x10xbf16, #tpu.memory_space<vmem>>, vector<2048x10xbf16>
    %cst_12 = arith.constant dense<0.000000e+00> : vector<2x10xf32>
    %10 = tpu.matmul %8, %9, %cst_12 {dimension_numbers = #tpu.dot_dimension_numbers<[1], [0], [0], [1], [0, 0, 1, 1], [], []>} : vector<2x2048xbf16>, vector<2048x10xbf16>, vector<2x10xf32> -> vector<2x10xf32>
    %c0_13 = arith.constant 0 : index
    %c0_14 = arith.constant 0 : index
    %11 = vector.load %arg2[%c0_13, %c0_14] : memref<2x1664xbf16, #tpu.memory_space<vmem>>, vector<2x1664xbf16>
    %c0_15 = arith.constant 0 : index
    %c0_16 = arith.constant 0 : index
    %12 = vector.load %arg4[%c0_15, %c0_16] : memref<1664x10xbf16, #tpu.memory_space<vmem>>, vector<1664x10xbf16>
    %cst_17 = arith.constant dense<0.000000e+00> : vector<2x10xf32>
    %13 = tpu.matmul %11, %12, %cst_17 {dimension_numbers = #tpu.dot_dimension_numbers<[1], [0], [0], [1], [0, 0, 1, 1], [], []>} : vector<2x1664xbf16>, vector<1664x10xbf16>, vector<2x10xf32> -> vector<2x10xf32>
    %14 = arith.addf %10, %13 : vector<2x10xf32>
    %c0_18 = arith.constant 0 : index
    %c0_19 = arith.constant 0 : index
    %15 = vector.load %arg5[%c0_18, %c0_19] : memref<1x10xf32, #tpu.memory_space<vmem>>, vector<1x10xf32>
    %16 = vector.broadcast %15 : vector<1x10xf32> to vector<2x10xf32>
    %17 = arith.addf %14, %16 : vector<2x10xf32>
    %cst_20 = arith.constant dense<0xFF800000> : vector<2xf32>
    %18 = vector.multi_reduction <maximumf>, %17, %cst_20 [1] : vector<2x10xf32> to vector<2xf32>
    %19 = vector.shape_cast %18 : vector<2xf32> to vector<2x1xf32>
    %20 = vector.broadcast %19 : vector<2x1xf32> to vector<2x10xf32>
    %21 = arith.subf %17, %20 : vector<2x10xf32>
    %22 = math.exp %21 : vector<2x10xf32>
    %cst_21 = arith.constant dense<0.000000e+00> : vector<2xf32>
    %23 = vector.multi_reduction <add>, %22, %cst_21 [1] : vector<2x10xf32> to vector<2xf32>
    %24 = vector.shape_cast %23 : vector<2xf32> to vector<2x1xf32>
    %25 = vector.broadcast %24 : vector<2x1xf32> to vector<2x10xf32>
    %26 = arith.divf %22, %25 : vector<2x10xf32>
    %c0_22 = arith.constant 0 : index
    %c0_23 = arith.constant 0 : index
    %27 = vector.load %arg6[%c0_22, %c0_23] : memref<2x10xf32, #tpu.memory_space<vmem>>, vector<2x10xf32>
    tpu.vector_store %arg6[%c0_22, %c0_23], %26 {strides = array<i32>} : memref<2x10xf32, #tpu.memory_space<vmem>>, vector<2x10xf32>,
    return
  }
  func.func @transform_0(%arg0: i32) -> (i32, i32) {
    %c0_i32 = arith.constant 0 : i32
    %c0_i32_0 = arith.constant 0 : i32
    return %arg0, %c0_i32 : i32, i32
  }
  func.func @transform_1(%arg0: i32) -> (i32, i32) {
    %c0_i32 = arith.constant 0 : i32
    %c0_i32_0 = arith.constant 0 : i32
    return %arg0, %c0_i32 : i32, i32
  }
  func.func @transform_2(%arg0: i32) -> (i32, i32) {
    %c0_i32 = arith.constant 0 : i32
    %c0_i32_0 = arith.constant 0 : i32
    %c0_i32_1 = arith.constant 0 : i32
    return %c0_i32, %c0_i32_0 : i32, i32
  }
  func.func @transform_3(%arg0: i32) -> (i32, i32) {
    %c0_i32 = arith.constant 0 : i32
    %c0_i32_0 = arith.constant 0 : i32
    %c0_i32_1 = arith.constant 0 : i32
    return %c0_i32, %c0_i32_0 : i32, i32
  }
  func.func @transform_4(%arg0: i32) -> (i32, i32) {
    %c0_i32 = arith.constant 0 : i32
    %c0_i32_0 = arith.constant 0 : i32
    %c0_i32_1 = arith.constant 0 : i32
    return %c0_i32, %c0_i32_0 : i32, i32
  }
  func.func @transform_5(%arg0: i32) -> (i32, i32) {
    %c0_i32 = arith.constant 0 : i32
    %c0_i32_0 = arith.constant 0 : i32
    return %arg0, %c0_i32 : i32, i32
  }
}

</mosaic_0001>

<bundles_post_ra>
// kernel: tpu_custom_call.1
= control target key start
LH: loop header
LB: loop body
LE: loop exit
PB: predicated region body
PF: predicated region fallthrough
CT: control target
= control target key end

     0   :  { %s4589_s0 = inlined_call_operand.vmem [shape: bf16[2,2048], index: 0, kind: input, shape index: {}]   ;;  %s4590_s1 = inlined_call_operand.vmem [shape: bf16[2,1664], index: 1, kind: input, shape index: {}]   ;;  %s4591_s2 = inlined_call_operand.vmem [shape: bf16[2048,10], index: 2, kind: input, shape index: {}]   ;;  %s4592_s3 = inlined_call_operand.vmem [shape: bf16[1664,10], index: 3, kind: input, shape index: {}]   ;;  %s4593_s4 = inlined_call_operand.vmem [shape: f32[1,10], index: 4, kind: input, shape index: {}]   ;;  %s4594_s5 = inlined_call_operand.hbm [shape: f32[2,10], index: 5, kind: output, shape index: {}]  }
   0x1   :  { %v3660_v0 = vld [vmem:[%s4592_s3 + $0x38] sm:$0xff]  ;;  %v3659_v4 = vld [vmem:[%s4592_s3 + $0x30] sm:$0xff]  ;;  %v3658_v8 = vld [vmem:[%s4592_s3 + $0x28] sm:$0xff] }
   0x2   :  { %v3676_v1 = vld [vmem:[%s4592_s3 + $0xb8] sm:$0xff]  ;;  %1369 = vmatpush.bf16.msra.mxu0 %v3660_v0  ;;  %v3675_v5 = vld [vmem:[%s4592_s3 + $0xb0] sm:$0xff]  ;;  %v3674_v9 = vld [vmem:[%s4592_s3 + $0xa8] sm:$0xff] }
   0x3   :  { %v3668_v2 = vld [vmem:[%s4592_s3 + $0x78] sm:$0xff]  ;;  %1395 = vmatpush.bf16.msra.mxu2 %v3676_v1  ;;  %v3667_v6 = vld [vmem:[%s4592_s3 + $0x70] sm:$0xff]  ;;  %v3666_v10 = vld [vmem:[%s4592_s3 + $0x68] sm:$0xff] }
   0x4   :  { %v3684_v3 = vld [vmem:[%s4592_s3 + $0xf8] sm:$0xff]  ;;  %1382 = vmatpush.bf16.msra.mxu1 %v3668_v2  ;;  %v3683_v7 = vld [vmem:[%s4592_s3 + $0xf0] sm:$0xff]  ;;  %v3682_v11 = vld [vmem:[%s4592_s3 + $0xe8] sm:$0xff] }
   0x5   :  { %1408 = vmatpush.bf16.msra.mxu3 %v3684_v3  ;;  %v3657_v12 = vld [vmem:[%s4592_s3 + $0x20] sm:$0xff]  ;;  %v3656_v16 = vld [vmem:[%s4592_s3 + $0x18] sm:$0xff]  ;;  %v3655_v21 = vld [vmem:[%s4592_s3 + $0x10] sm:$0xff] }
   0x6   :  { %1370 = vmatpush.bf16.msra.mxu0 %v3659_v4  ;;  %v3673_v13 = vld [vmem:[%s4592_s3 + $0xa0] sm:$0xff]  ;;  %v3672_v17 = vld [vmem:[%s4592_s3 + $0x98] sm:$0xff]  ;;  %v3671_v22 = vld [vmem:[%s4592_s3 + $0x90] sm:$0xff] }
   0x7   :  { %1396 = vmatpush.bf16.msra.mxu2 %v3675_v5  ;;  %v3665_v14 = vld [vmem:[%s4592_s3 + $0x60] sm:$0xff]  ;;  %v3664_v18 = vld [vmem:[%s4592_s3 + $0x58] sm:$0xff]  ;;  %v3663_v25 = vld [vmem:[%s4592_s3 + $0x50] sm:$0xff] }
   0x8   :  { %1383 = vmatpush.bf16.msra.mxu1 %v3667_v6  ;;  %v3681_v15 = vld [vmem:[%s4592_s3 + $0xe0] sm:$0xff]  ;;  %v3680_v19 = vld [vmem:[%s4592_s3 + $0xd8] sm:$0xff]  ;;  %v3679_v26 = vld [vmem:[%s4592_s3 + $0xd0] sm:$0xff] }
   0x9   :  { %1409 = vmatpush.bf16.msra.mxu3 %v3683_v7  ;;  %v21_v20 = vld [vmem:[%s4589_s0] sm:$0xff] }
   0xa   :  { %1371 = vmatpush.bf16.msra.mxu0 %v3658_v8  ;;  %v23_v23 = vunpack.c.l.bf16 %v21_v20  ;;  %v24_v24 = vunpack.c.h.bf16 %v21_v20 }
   0xb   :  { %1397 = vmatpush.bf16.msra.mxu2 %v3674_v9 }
   0xc   :  { %1384 = vmatpush.bf16.msra.mxu1 %v3666_v10 }
   0xd   :  { %1410 = vmatpush.bf16.msra.mxu3 %v3682_v11 }
   0xe   :  { %1372 = vmatpush.bf16.msra.mxu0 %v3657_v12 }
   0xf   :  { %1398 = vmatpush.bf16.msra.mxu2 %v3673_v13 }
  0x10   :  { %1385 = vmatpush.bf16.msra.mxu1 %v3665_v14 }
  0x11   :  { %1411 = vmatpush.bf16.msra.mxu3 %v3681_v15 }
  0x12   :  { %1373 = vmatpush.bf16.msra.mxu0 %v3656_v16 }
  0x13   :  { %1399 = vmatpush.bf16.msra.mxu2 %v3672_v17 }
  0x14   :  { %1386 = vmatpush.bf16.msra.mxu1 %v3664_v18 }
  0x15   :  { %1412 = vmatpush.bf16.msra.mxu3 %v3680_v19 }
  0x16   :  { %10 = vsyncpa [#allocation3], 0  ;;  %v27_v27 = vmax.f32 %v23_v23, 0.0  ;;  %v28_v28 = vmax.f32 %v24_v24, 0.0  ;;  %v22_v29 = vld [vmem:[%s4589_s0 + $0x8] sm:$0xff]  ;;  %1374 = vmatpush.bf16.msra.mxu0 %v3655_v21  ;;  %v3653_v36 = vld [vmem:[%s4592_s3] sm:$0xff] }
  0x17   :  { %1400 = vmatpush.bf16.msra.mxu2 %v3671_v22  ;;  %v3654_v30 = vld [vmem:[%s4592_s3 + $0x8] sm:$0xff]  ;;  %v25_v34 = vunpack.c.l.bf16 %v22_v29  ;;  %v26_v35 = vunpack.c.h.bf16 %v22_v29  ;;  %v3669_v37 = vld [vmem:[%s4592_s3 + $0x80] sm:$0xff]  ;;  %v3692_v38 = vld [vmem:[%s4592_s3 + $0x138] sm:$0xff]  ;;  %vm102_vm0 = vcmask 1040384   ;;  %vm106_vm1 = vcmask 1042434   ;;  %s2588_s21 = sshll.u32 %s4594_s5, 4  ;;  %s2589_s21 = int_to_ptr.hbm [resolvable:$true] %s2588_s21 }
  0x18   :  { %v3670_v31 = vld [vmem:[%s4592_s3 + $0x88] sm:$0xff]  ;;  %35 = vst [vmem:[#allocation1] ss:$4 sm:$0xff] %v27_v27  ;;  %1387 = vmatpush.bf16.msra.mxu1 %v3663_v25  ;;  %v3708_v39 = vld [vmem:[%s4592_s3 + $0x1b8] sm:$0xff]  ;;  %v3661_v40 = vld [vmem:[%s4592_s3 + $0x40] sm:$0xff]  ;;  %vm110_vm2 = vcmask 1041408  }
  0x19   :  { %1413 = vmatpush.bf16.msra.mxu3 %v3679_v26  ;;  %v3662_v32 = vld [vmem:[%s4592_s3 + $0x48] sm:$0xff]  ;;  %37 = vst [vmem:[#allocation1 + $0x20] ss:$4 sm:$0xff] %v28_v28  ;;  %v3677_v41 = vld [vmem:[%s4592_s3 + $0xc0] sm:$0xff]  ;;  %v3700_v42 = vld [vmem:[%s4592_s3 + $0x178] sm:$0xff]  ;;  %v29_v44 = vmax.f32 %v25_v34, 0.0 }
  0x1a   :  { %v3678_v33 = vld [vmem:[%s4592_s3 + $0xc8] sm:$0xff]  ;;  %1375 = vmatpush.bf16.msra.mxu0 %v3654_v30  ;;  %v3716_v43 = vld [vmem:[%s4592_s3 + $0x1f8] sm:$0xff]  ;;  %v30_v45 = vmax.f32 %v26_v35, 0.0  ;;  %vm112_vm3 = vcmask 1044484   ;;  %v3691_v46 = vld [vmem:[%s4592_s3 + $0x130] sm:$0xff]  ;;  %vm116_vm4 = vcmask 1046534  }
  0x1b   :  { %1401 = vmatpush.bf16.msra.mxu2 %v3670_v31  ;;  %v3707_v47 = vld [vmem:[%s4592_s3 + $0x1b0] sm:$0xff]  ;;  %v143_v50 = vld [vmem:[%s4590_s1] sm:$0xff]  ;;  %v3690_v6 = vld [vmem:[%s4592_s3 + $0x128] sm:$0xff]  ;;  %vm120_vm5 = vcmask 1045508   ;;  %vm122_vm6 = vcmask 1043456   ;;  %vm234_vm7 = vcmask 1043459  }
  0x1c   :  { %1388 = vmatpush.bf16.msra.mxu1 %v3662_v32  ;;  %v3699_v54 = vld [vmem:[%s4592_s3 + $0x170] sm:$0xff]  ;;  %v145_v4 = vunpack.c.l.bf16 %v143_v50  ;;  %v146_v5 = vunpack.c.h.bf16 %v143_v50  ;;  %v3706_v7 = vld [vmem:[%s4592_s3 + $0x1a8] sm:$0xff]  ;;  %v3689_v17 = vld [vmem:[%s4592_s3 + $0x120] sm:$0xff]  ;;  %vm238_vm8 = vcmask 1044483   ;;  %vm241_vm9 = vcmask 1042432  }
  0x1d   :  { %1414 = vmatpush.bf16.msra.mxu3 %v3678_v33  ;;  %v3715_v61 = vld [vmem:[%s4592_s3 + $0x1f0] sm:$0xff]  ;;  %v3698_v14 = vld [vmem:[%s4592_s3 + $0x168] sm:$0xff]  ;;  %v3705_v19 = vld [vmem:[%s4592_s3 + $0x1a0] sm:$0xff]  ;;  %vm2555_vm10 = vcmask 74752  }
  0x1e   :  { %1376 = vmatpush.bf16.msra.mxu0 %v3653_v36  ;;  %v3714_v15 = vld [vmem:[%s4592_s3 + $0x1e8] sm:$0xff]  ;;  %v3697_v20 = vld [vmem:[%s4592_s3 + $0x160] sm:$0xff]  ;;  %v149_v23 = vmax.f32 %v145_v4, 0.0  ;;  %v150_v24 = vmax.f32 %v146_v5, 0.0  ;;  %v3688_v28 = vld [vmem:[%s4592_s3 + $0x118] sm:$0xff] }
  0x1f   :  { %v38_v48 = vld.sshfl [vmem:[#allocation1] sm:$0xff pattern:$0x73625140]  ;;  %v39_v49 = vld.sshfl [vmem:[#allocation1 + $0x8] sm:$0xff pattern:$0x73625140]  ;;  %1402 = vmatpush.bf16.msra.mxu2 %v3669_v37 }
  0x20   :  { %v40_v51 = vld.sshfl [vmem:[#allocation1 + $0x10] sm:$0xff pattern:$0x73625140]  ;;  %v41_v52 = vld.sshfl [vmem:[#allocation1 + $0x18] sm:$0xff pattern:$0x73625140]  ;;  %v72_v53 = vpack.c.bf16 %v39_v49, %v38_v48  ;;  %1389 = vmatpush.bf16.msra.mxu1 %v3661_v40 }
  0x21   :  { %v42_v55 = vld.sshfl [vmem:[#allocation1 + $0x20] sm:$0xff pattern:$0x73625140]  ;;  %v43_v56 = vld.sshfl [vmem:[#allocation1 + $0x28] sm:$0xff pattern:$0x73625140]  ;;  %v73_v57 = vpack.c.bf16 %v41_v52, %v40_v51  ;;  %1415 = vmatpush.bf16.msra.mxu3 %v3677_v41 }
  0x22   :  { %1421 = vmatpush.bf16.msrb.mxu0 %v3692_v38  ;;  %v44_v58 = vld.sshfl [vmem:[#allocation1 + $0x30] sm:$0xff pattern:$0x73625140]  ;;  %v45_v59 = vld.sshfl [vmem:[#allocation1 + $0x38] sm:$0xff pattern:$0x73625140]  ;;  %v74_v60 = vpack.c.bf16 %v43_v56, %v42_v55 }
  0x23   :  { %1447 = vmatpush.bf16.msrb.mxu2 %v3708_v39  ;;  %46 = vst [vmem:[#allocation1] ss:$4 sm:$0xff] %v29_v44  ;;  %v75_v62 = vpack.c.bf16 %v45_v59, %v44_v58  ;;  %v88_v63 = vrot.slane %v72_v53, 3  ;;  %v89_v0 = vrot.slane %v73_v57, 6  ;;  %v90_v1 = vrot.slane %v73_v57, 1  ;;  %v3713_v21 = vld [vmem:[%s4592_s3 + $0x1e0] sm:$0xff] }
  0x24   :  { %1434 = vmatpush.bf16.msrb.mxu1 %v3700_v42  ;;  %47 = vst [vmem:[#allocation1 + $0x20] ss:$4 sm:$0xff] %v30_v45  ;;  %v91_v2 = vrot.slane %v74_v60, 4  ;;  %v92_v3 = vrot.slane %v74_v60, 7  ;;  %v144_v27 = vld [vmem:[%s4590_s1 + $0x8] sm:$0x1f] }
  0x25   :  { %1460 = vmatpush.bf16.msrb.mxu3 %v3716_v43  ;;  %v93_v8 = vrot.slane %v75_v62, 2  ;;  %v94_v9 = vrot.slane %v75_v62, 5  ;;  %v105_v10 = vsel %vm102_vm0, %v72_v53, %v88_v63  ;;  %v109_v11 = vsel %vm106_vm1, %v89_v0, %v90_v1  ;;  %v3704_v29 = vld [vmem:[%s4592_s3 + $0x198] sm:$0xff]  ;;  %v3687_v55 = vld [vmem:[%s4592_s3 + $0x110] sm:$0xff]  ;;  %v3686_v0 = vld [vmem:[%s4592_s3 + $0x108] sm:$0xff] }
  0x26   :  { %1422 = vmatpush.bf16.msrb.mxu0 %v3691_v46  ;;  %v111_v12 = vsel %vm110_vm2, %v105_v10, %v109_v11  ;;  %v115_v13 = vsel %vm112_vm3, %v91_v2, %v92_v3  ;;  %v3696_v43 = vld [vmem:[%s4592_s3 + $0x158] sm:$0xff]  ;;  %v148_v48 = vunpack.c.h.bf16 %v144_v27  ;;  %v3703_v56 = vld [vmem:[%s4592_s3 + $0x190] sm:$0xff]  ;;  %v3702_v1 = vld [vmem:[%s4592_s3 + $0x188] sm:$0xff] }
  0x27   :  { %1448 = vmatpush.bf16.msrb.mxu2 %v3707_v47  ;;  %v119_v16 = vsel %vm116_vm4, %v93_v8, %v94_v9  ;;  %v3712_v44 = vld [vmem:[%s4592_s3 + $0x1d8] sm:$0xff]  ;;  %v147_v47 = vunpack.c.l.bf16 %v144_v27  ;;  %v3695_v59 = vld [vmem:[%s4592_s3 + $0x150] sm:$0xff]  ;;  %v3694_v3 = vld [vmem:[%s4592_s3 + $0x148] sm:$0xff] }
  0x28   :  { %1435 = vmatpush.bf16.msrb.mxu1 %v3699_v54  ;;  %v121_v18 = vsel %vm120_vm5, %v115_v13, %v119_v16  ;;  %v3711_v60 = vld [vmem:[%s4592_s3 + $0x1d0] sm:$0xff]  ;;  %v152_v63 = vmax.f32 %v148_v48, 0.0  ;;  %v3710_v4 = vld [vmem:[%s4592_s3 + $0x1c8] sm:$0xff]  ;;  %v3685_v10 = vld [vmem:[%s4592_s3 + $0x100] sm:$0xff] }
  0x29   :  { %1461 = vmatpush.bf16.msrb.mxu3 %v3715_v61  ;;  %v3980_v22 = vsel %vm122_vm6, %v111_v12, %v121_v18  ;;  %v151_v62 = vmax.f32 %v147_v47, 0.0  ;;  %v3701_v11 = vld [vmem:[%s4592_s3 + $0x180] sm:$0xff] }
  0x2a   :  { %1423 = vmatpush.bf16.msrb.mxu0 %v3690_v6  ;;  %v48_v25 = vld.sshfl [vmem:[#allocation1] sm:$0xff pattern:$0x73625140]  ;;  %v49_v26 = vld.sshfl [vmem:[#allocation1 + $0x8] sm:$0xff pattern:$0x73625140]  ;;  %141 = vst [vmem:[%s4589_s0] sm:$0xff] %v3980_v22 }
  0x2b   :  { %1449 = vmatpush.bf16.msrb.mxu2 %v3706_v7  ;;  %v50_v30 = vld.sshfl [vmem:[#allocation1 + $0x10] sm:$0xff pattern:$0x73625140]  ;;  %v51_v31 = vld.sshfl [vmem:[#allocation1 + $0x18] sm:$0xff pattern:$0x73625140]  ;;  %v76_v32 = vpack.c.bf16 %v49_v26, %v48_v25 }
  0x2c   :  { %1436 = vmatpush.bf16.msrb.mxu1 %v3698_v14  ;;  %v52_v33 = vld.sshfl [vmem:[#allocation1 + $0x20] sm:$0xff pattern:$0x73625140]  ;;  %v53_v34 = vld.sshfl [vmem:[#allocation1 + $0x28] sm:$0xff pattern:$0x73625140]  ;;  %v77_v35 = vpack.c.bf16 %v51_v31, %v50_v30 }
  0x2d   :  { %1462 = vmatpush.bf16.msrb.mxu3 %v3714_v15  ;;  %v54_v36 = vld.sshfl [vmem:[#allocation1 + $0x30] sm:$0xff pattern:$0x73625140]  ;;  %v55_v37 = vld.sshfl [vmem:[#allocation1 + $0x38] sm:$0xff pattern:$0x73625140]  ;;  %v78_v38 = vpack.c.bf16 %v53_v34, %v52_v33 }
  0x2e   :  { %1424 = vmatpush.bf16.msrb.mxu0 %v3689_v17  ;;  %v79_v39 = vpack.c.bf16 %v55_v37, %v54_v36  ;;  %v95_v40 = vrot.slane %v76_v32, 3  ;;  %v96_v41 = vrot.slane %v77_v35, 6  ;;  %v97_v42 = vrot.slane %v77_v35, 1  ;;  %157 = vst [vmem:[#allocation1] ss:$4 sm:$0xff] %v149_v23  ;;  %v3693_v25 = vld [vmem:[%s4592_s3 + $0x140] sm:$0xff] }
  0x2f   :  { %1450 = vmatpush.bf16.msrb.mxu2 %v3705_v19  ;;  %v98_v45 = vrot.slane %v78_v38, 4  ;;  %v99_v46 = vrot.slane %v78_v38, 7  ;;  %159 = vst [vmem:[#allocation1 + $0x20] ss:$4 sm:$0xff] %v150_v24  ;;  %v3709_v26 = vld [vmem:[%s4592_s3 + $0x1c0] sm:$0xff] }
  0x30   :  { %1437 = vmatpush.bf16.msrb.mxu1 %v3697_v20  ;;  %v100_v49 = vrot.slane %v79_v39, 2  ;;  %v101_v50 = vrot.slane %v79_v39, 5  ;;  %v126_v51 = vsel %vm102_vm0, %v76_v32, %v95_v40  ;;  %v129_v52 = vsel %vm106_vm1, %v96_v41, %v97_v42 }
  0x31   :  { %1463 = vmatpush.bf16.msrb.mxu3 %v3713_v21  ;;  %v130_v53 = vsel %vm110_vm2, %v126_v51, %v129_v52  ;;  %v133_v54 = vsel %vm112_vm3, %v98_v45, %v99_v46  ;;  %v3724_v52 = vld [vmem:[%s4592_s3 + $0x238] sm:$0xff] }
  0x32   :  { %1425 = vmatpush.bf16.msrb.mxu0 %v3688_v28  ;;  %v136_v57 = vsel %vm116_vm4, %v100_v49, %v101_v50 }
  0x33   :  { %1451 = vmatpush.bf16.msrb.mxu2 %v3704_v29  ;;  %v137_v58 = vsel %vm120_vm5, %v133_v54, %v136_v57  ;;  %v3740_v54 = vld [vmem:[%s4592_s3 + $0x2b8] sm:$0xff] }
  0x34   :  { %1438 = vmatpush.bf16.msrb.mxu1 %v3696_v43  ;;  %v4020_v61 = vsel %vm122_vm6, %v130_v53, %v137_v58 }
  0x35   :  { %1464 = vmatpush.bf16.msrb.mxu3 %v3712_v44  ;;  %142 = vst [vmem:[%s4589_s0 + $0x8] sm:$0xff] %v4020_v61  ;;  %v160_v2 = vld.sshfl [vmem:[#allocation1] sm:$0xff pattern:$0x73625140] }
  0x36   :  { %1426 = vmatpush.bf16.msrb.mxu0 %v3687_v55  ;;  %v161_v5 = vld.sshfl [vmem:[#allocation1 + $0x8] sm:$0xff pattern:$0x73625140]  ;;  %v162_v6 = vld.sshfl [vmem:[#allocation1 + $0x10] sm:$0xff pattern:$0x73625140] }
  0x37   :  { %1452 = vmatpush.bf16.msrb.mxu2 %v3703_v56  ;;  %v163_v7 = vld.sshfl [vmem:[#allocation1 + $0x18] sm:$0xff pattern:$0x73625140]  ;;  %v164_v8 = vld.sshfl [vmem:[#allocation1 + $0x20] sm:$0xff pattern:$0x73625140]  ;;  %v188_v9 = vpack.c.bf16 %v161_v5, %v160_v2 }
  0x38   :  { %1439 = vmatpush.bf16.msrb.mxu1 %v3695_v59  ;;  %v165_v12 = vld.sshfl [vmem:[#allocation1 + $0x28] sm:$0xff pattern:$0x73625140]  ;;  %v166_v13 = vld.sshfl [vmem:[#allocation1 + $0x30] sm:$0xff pattern:$0x73625140]  ;;  %v189_v14 = vpack.c.bf16 %v163_v7, %v162_v6 }
  0x39   :  { %1465 = vmatpush.bf16.msrb.mxu3 %v3711_v60  ;;  %v167_v15 = vld.sshfl [vmem:[#allocation1 + $0x38] sm:$0xff pattern:$0x73625140]  ;;  %168 = vst [vmem:[#allocation1] ss:$4 sm:$0xff] %v151_v62  ;;  %v190_v16 = vpack.c.bf16 %v165_v12, %v164_v8  ;;  %v202_v17 = vrot.slane %v188_v9, 3 }
  0x3a   :  { %1427 = vmatpush.bf16.msrb.mxu0 %v3686_v0  ;;  %169 = vst [vmem:[#allocation1 + $0x20] ss:$4 sm:$0xff] %v152_v63  ;;  %v191_v18 = vpack.c.bf16 %v167_v15, %v166_v13  ;;  %v203_v19 = vrot.slane %v189_v14, 6  ;;  %v204_v20 = vrot.slane %v189_v14, 1  ;;  %v3732_v55 = vld [vmem:[%s4592_s3 + $0x278] sm:$0xff]  ;;  %v3723_v62 = vld [vmem:[%s4592_s3 + $0x230] sm:$0xff] }
  0x3b   :  { %1453 = vmatpush.bf16.msrb.mxu2 %v3702_v1  ;;  %v205_v21 = vrot.slane %v190_v16, 4  ;;  %v206_v23 = vrot.slane %v190_v16, 7  ;;  %v216_v24 = vsel %vm102_vm0, %v188_v9, %v202_v17  ;;  %v3748_v56 = vld [vmem:[%s4592_s3 + $0x2f8] sm:$0xff]  ;;  %v3739_v63 = vld [vmem:[%s4592_s3 + $0x2b0] sm:$0xff]  ;;  %v3722_v2 = vld [vmem:[%s4592_s3 + $0x228] sm:$0xff] }
  0x3c   :  { %1440 = vmatpush.bf16.msrb.mxu1 %v3694_v3  ;;  %v207_v27 = vrot.slane %v191_v18, 2  ;;  %v208_v28 = vrot.slane %v191_v18, 5  ;;  %v219_v29 = vsel %vm106_vm1, %v203_v19, %v204_v20  ;;  %v3731_v0 = vld [vmem:[%s4592_s3 + $0x270] sm:$0xff]  ;;  %v3738_v5 = vld [vmem:[%s4592_s3 + $0x2a8] sm:$0xff]  ;;  %v3737_v12 = vld [vmem:[%s4592_s3 + $0x2a0] sm:$0xff] }
  0x3d   :  { %1466 = vmatpush.bf16.msrb.mxu3 %v3710_v4  ;;  %v220_v30 = vsel %vm110_vm2, %v216_v24, %v219_v29  ;;  %v223_v31 = vsel %vm112_vm3, %v205_v21, %v206_v23  ;;  %v3747_v1 = vld [vmem:[%s4592_s3 + $0x2f0] sm:$0xff]  ;;  %v3730_v9 = vld [vmem:[%s4592_s3 + $0x268] sm:$0xff]  ;;  %v3729_v13 = vld [vmem:[%s4592_s3 + $0x260] sm:$0xff] }
  0x3e   :  { %1428 = vmatpush.bf16.msrb.mxu0 %v3685_v10  ;;  %v226_v32 = vsel %vm116_vm4, %v207_v27, %v208_v28  ;;  %v3746_v10 = vld [vmem:[%s4592_s3 + $0x2e8] sm:$0xff]  ;;  %v3745_v14 = vld [vmem:[%s4592_s3 + $0x2e0] sm:$0xff]  ;;  %v3720_v15 = vld [vmem:[%s4592_s3 + $0x218] sm:$0xff] }
  0x3f   :  { %1454 = vmatpush.bf16.msrb.mxu2 %v3701_v11  ;;  %v227_v33 = vsel %vm120_vm5, %v223_v31, %v226_v32  ;;  %v3721_v11 = vld [vmem:[%s4592_s3 + $0x220] sm:$0xff]  ;;  %v3736_v16 = vld [vmem:[%s4592_s3 + $0x298] sm:$0xff]  ;;  %v3719_v19 = vld [vmem:[%s4592_s3 + $0x210] sm:$0xff] }
  0x40   :  { %1441 = vmatpush.bf16.msrb.mxu1 %v3693_v25  ;;  %v170_v34 = vld.sshfl [vmem:[#allocation1] sm:$0xff pattern:$0x73625140]  ;;  %v171_v35 = vld.sshfl [vmem:[#allocation1 + $0x8] sm:$0xff pattern:$0x73625140]  ;;  %v228_v36 = vsel %vm122_vm6, %v220_v30, %v227_v33 }
  0x41   :  { %1467 = vmatpush.bf16.msrb.mxu3 %v3709_v26  ;;  %v172_v37 = vld.sshfl [vmem:[#allocation1 + $0x10] sm:$0xff pattern:$0x73625140]  ;;  %v173_v38 = vld.sshfl [vmem:[#allocation1 + $0x18] sm:$0xff pattern:$0x73625140]  ;;  %v192_v39 = vpack.c.bf16 %v171_v35, %v170_v34  ;;  %245 = vst [vmem:[%s4590_s1] sm:$0xff] %v228_v36 }
  0x42   :  { %v174_v40 = vld.sshfl [vmem:[#allocation1 + $0x20] sm:$0xff pattern:$0x73625140]  ;;  %v193_v41 = vpack.c.bf16 %v173_v38, %v172_v37  ;;  %v3728_v17 = vld [vmem:[%s4592_s3 + $0x258] sm:$0xff]  ;;  %v3735_v20 = vld [vmem:[%s4592_s3 + $0x290] sm:$0xff] }
  0x43   :  { %v194_v42 = vpack.c.bf16 %v174_v40, %v174_v40  ;;  %v209_v43 = vrot.slane %v192_v39, 3  ;;  %716 = vst [vmem:[#allocation1] ss:$9 sm:$0xff] %v228_v36  ;;  %v3744_v18 = vld [vmem:[%s4592_s3 + $0x2d8] sm:$0xff]  ;;  %v3727_v21 = vld [vmem:[%s4592_s3 + $0x250] sm:$0xff]  ;;  %v3718_v24 = vld [vmem:[%s4592_s3 + $0x208] sm:$0xff] }
  0x44   :  { %v210_v44 = vrot.slane %v193_v41, 6  ;;  %v211_v45 = vrot.slane %v193_v41, 1  ;;  %v3743_v23 = vld [vmem:[%s4592_s3 + $0x2d0] sm:$0xff]  ;;  %v3734_v25 = vld [vmem:[%s4592_s3 + $0x288] sm:$0xff]  ;;  %v3717_v28 = vld [vmem:[%s4592_s3 + $0x200] sm:$0xff] }
  0x45   :  { %v212_v46 = vrot.slane %v194_v42, 4  ;;  %v213_v47 = vrot.slane %v194_v42, 7  ;;  %v231_v48 = vsel %vm102_vm0, %v192_v39, %v209_v43  ;;  %v3726_v26 = vld [vmem:[%s4592_s3 + $0x248] sm:$0xff]  ;;  %v3733_v29 = vld [vmem:[%s4592_s3 + $0x280] sm:$0xff]  ;;  %v3756_v30 = vld [vmem:[%s4592_s3 + $0x338] sm:$0xff] }
  0x46   :  { %v233_v49 = vsel %vm110_vm2, %v231_v48, %v210_v44  ;;  %v3742_v27 = vld [vmem:[%s4592_s3 + $0x2c8] sm:$0xff]  ;;  %v3540_v31 = vld [vmem:[%s4591_s2 + $0x78] sm:$0xff]  ;;  %v3725_v32 = vld [vmem:[%s4592_s3 + $0x240] sm:$0xff] }
  0x47   :  { %v237_v50 = vsel %vm234_vm7, %v211_v45, %v212_v46  ;;  %v3741_v33 = vld [vmem:[%s4592_s3 + $0x2c0] sm:$0xff]  ;;  %v3532_v34 = vld [vmem:[%s4591_s2 + $0x38] sm:$0xff]  ;;  %v3755_v41 = vld [vmem:[%s4592_s3 + $0x330] sm:$0xff] }
  0x48   :  { %v240_v51 = vsel %vm238_vm8, %v237_v50, %v213_v47  ;;  %v3548_v37 = vld [vmem:[%s4591_s2 + $0xb8] sm:$0xff]  ;;  %v3539_v42 = vld [vmem:[%s4591_s2 + $0x70] sm:$0xff]  ;;  %v3754_v44 = vld [vmem:[%s4592_s3 + $0x328] sm:$0xff] }
  0x49   :  { %v242_v53 = vsel %vm241_vm9, %v233_v49, %v240_v51  ;;  %v3531_v43 = vld [vmem:[%s4591_s2 + $0x30] sm:$0xff]  ;;  %v3538_v45 = vld [vmem:[%s4591_s2 + $0x68] sm:$0xff]  ;;  %v3753_v48 = vld [vmem:[%s4592_s3 + $0x320] sm:$0xff] }
  0x4a   :  { %246 = vst [vmem:[%s4590_s1 + $0x8] sm:$0x1f] %v242_v53  ;;  %v717_v57 = vld [vmem:[#allocation1] sm:$0xff]  ;;  %v719_v58 = vld [vmem:[#allocation1 + $0x12] sm:$0xff]  ;;  %v718_v59 = vld [vmem:[#allocation1 + $0x9] sm:$0xff] }
  0x4b   :  { %1377 = vmatmul.bf16.vlgmr.msra.gmra.mxu0 %v717_v57  ;;  %1403 = vmatmul.bf16.vlgmr.msra.gmra.mxu2 %v719_v58  ;;  %v720_v60 = vld [vmem:[#allocation1 + $0x1b] sm:$0xff]  ;;  %v721_v3 = vld [vmem:[#allocation1 + $0x24] sm:$0xff]  ;;  %v722_v7 = vld [vmem:[#allocation1 + $0x2d] sm:$0xff] }
  0x4c   :  { %1390 = vmatmul.bf16.vlgmr.msra.gmra.mxu1 %v718_v59  ;;  %1416 = vmatmul.bf16.vlgmr.msra.gmra.mxu3 %v720_v60  ;;  %v723_v4 = vld [vmem:[#allocation1 + $0x36] sm:$0xff]  ;;  %v724_v8 = vld [vmem:[#allocation1 + $0x3f] sm:$0xff]  ;;  %v3530_v46 = vld [vmem:[%s4591_s2 + $0x28] sm:$0xff] }
  0x4d   :  { %1473 = vmatpush.bf16.msra.mxu0 %v3724_v52  ;;  %1499 = vmatpush.bf16.msra.mxu2 %v3740_v54  ;;  %v3546_v47 = vld [vmem:[%s4591_s2 + $0xa8] sm:$0xff]  ;;  %v3537_v49 = vld [vmem:[%s4591_s2 + $0x60] sm:$0xff]  ;;  %v3752_v52 = vld [vmem:[%s4592_s3 + $0x318] sm:$0xff] }
  0x4e   :  { %1486 = vmatpush.bf16.msra.mxu1 %v3732_v55  ;;  %1512 = vmatpush.bf16.msra.mxu3 %v3748_v56  ;;  %v3529_v50 = vld [vmem:[%s4591_s2 + $0x20] sm:$0xff]  ;;  %v3536_v53 = vld [vmem:[%s4591_s2 + $0x58] sm:$0xff]  ;;  %v3751_v56 = vld [vmem:[%s4592_s3 + $0x310] sm:$0xff] }
  0x4f   :  { %v3545_v51 = vld [vmem:[%s4591_s2 + $0xa0] sm:$0xff]  ;;  %v3528_v54 = vld [vmem:[%s4591_s2 + $0x18] sm:$0xff]  ;;  %v3535_v57 = vld [vmem:[%s4591_s2 + $0x50] sm:$0xff] }
  0x50   :  { %v3544_v55 = vld [vmem:[%s4591_s2 + $0x98] sm:$0xff]  ;;  %v3527_v58 = vld [vmem:[%s4591_s2 + $0x10] sm:$0xff]  ;;  %v3750_v60 = vld [vmem:[%s4592_s3 + $0x308] sm:$0xff] }
  0x51   :  { %v506_v6 = vld [vmem:[%s4590_s1 + $0x8] sm:$0x1f]  ;;  %1474 = vmatpush.bf16.msra.mxu0 %v3723_v62  ;;  %1500 = vmatpush.bf16.msra.mxu2 %v3739_v63  ;;  %v3543_v59 = vld [vmem:[%s4591_s2 + $0x90] sm:$0xff] }
  0x52   :  { %1487 = vmatpush.bf16.msra.mxu1 %v3731_v0  ;;  %1513 = vmatpush.bf16.msra.mxu3 %v3747_v1  ;;  %726 = vst [vmem:[#allocation1] ss:$9 sm:$0xff] %v506_v6  ;;  %v3534_v62 = vld [vmem:[%s4591_s2 + $0x48] sm:$0xff]  ;;  %v3749_v1 = vld [vmem:[%s4592_s3 + $0x300] sm:$0xff] }
  0x53   :  { %v3526_v63 = vld [vmem:[%s4591_s2 + $0x8] sm:$0xff]  ;;  %v3541_v6 = vld [vmem:[%s4591_s2 + $0x80] sm:$0xff] }
  0x54   :  { %v3542_v0 = vld [vmem:[%s4591_s2 + $0x88] sm:$0xff] }
  0x55   :  { %1475 = vmatpush.bf16.msra.mxu0 %v3722_v2  ;;  %1501 = vmatpush.bf16.msra.mxu2 %v3738_v5  ;;  %v3533_v2 = vld [vmem:[%s4591_s2 + $0x40] sm:$0xff] }
  0x56   :  { %1488 = vmatpush.bf16.msra.mxu1 %v3730_v9  ;;  %1514 = vmatpush.bf16.msra.mxu3 %v3746_v10  ;;  %v3525_v5 = vld [vmem:[%s4591_s2] sm:$0xff]  ;;  %v3580_v9 = vld [vmem:[%s4591_s2 + $0x1b8] sm:$0xff]  ;;  %v3555_v10 = vld [vmem:[%s4591_s2 + $0xf0] sm:$0xff] }
  0x59   :  { %1476 = vmatpush.bf16.msra.mxu0 %v3721_v11  ;;  %1502 = vmatpush.bf16.msra.mxu2 %v3737_v12  ;;  %v727_v35 = vld [vmem:[#allocation1] sm:$0xff]  ;;  %v729_v36 = vld [vmem:[#allocation1 + $0x12] sm:$0xff]  ;;  %v728_v38 = vld [vmem:[#allocation1 + $0x9] sm:$0xff] }
  0x5a   :  { %1489 = vmatpush.bf16.msra.mxu1 %v3729_v13  ;;  %1515 = vmatpush.bf16.msra.mxu3 %v3745_v14  ;;  %v730_v39 = vld [vmem:[#allocation1 + $0x1b] sm:$0xff]  ;;  %v4176_v40 = vld [vmem:[#allocation1 + $0x24] sm:$0xff]  ;;  %v3571_v13 = vld [vmem:[%s4591_s2 + $0x170] sm:$0xff] }
  0x5b   :  { %1429 = vmatmul.bf16.vlgmr.msrb.gmra.mxu0 %v721_v3  ;;  %1455 = vmatmul.bf16.vlgmr.msrb.gmra.mxu2 %v723_v4  ;;  %1539 = vst [vmem:[#allocation1] ss:$9 sm:$0xff] %v3980_v22  ;;  %v3547_v22 = vld [vmem:[%s4591_s2 + $0xb0] sm:$0xff]  ;;  %v3556_v3 = vld [vmem:[%s4591_s2 + $0xf8] sm:$0xff] }
  0x5c   :  { %1442 = vmatmul.bf16.vlgmr.msrb.gmra.mxu1 %v722_v7  ;;  %1468 = vmatmul.bf16.vlgmr.msrb.gmra.mxu3 %v724_v8  ;;  %v3572_v4 = vld [vmem:[%s4591_s2 + $0x178] sm:$0xff]  ;;  %v3563_v14 = vld [vmem:[%s4591_s2 + $0x130] sm:$0xff] }
  0x5d   :  { %1477 = vmatpush.bf16.msra.mxu0 %v3720_v15  ;;  %1503 = vmatpush.bf16.msra.mxu2 %v3736_v16  ;;  %v3564_v8 = vld [vmem:[%s4591_s2 + $0x138] sm:$0xff]  ;;  %v3579_v15 = vld [vmem:[%s4591_s2 + $0x1b0] sm:$0xff]  ;;  %v3554_v16 = vld [vmem:[%s4591_s2 + $0xe8] sm:$0xff] }
  0x5e   :  { %1490 = vmatpush.bf16.msra.mxu1 %v3728_v17  ;;  %1516 = vmatpush.bf16.msra.mxu3 %v3744_v18  ;;  %v3570_v17 = vld [vmem:[%s4591_s2 + $0x168] sm:$0xff] }
  0x5f   :  { %v3562_v18 = vld [vmem:[%s4591_s2 + $0x128] sm:$0xff] }
  0x61   :  { %1478 = vmatpush.bf16.msra.mxu0 %v3719_v19  ;;  %1504 = vmatpush.bf16.msra.mxu2 %v3735_v20  ;;  %v3578_v19 = vld [vmem:[%s4591_s2 + $0x1a8] sm:$0xff]  ;;  %v3553_v20 = vld [vmem:[%s4591_s2 + $0xe0] sm:$0xff] }
  0x62   :  { %1491 = vmatpush.bf16.msra.mxu1 %v3727_v21  ;;  %1517 = vmatpush.bf16.msra.mxu3 %v3743_v23  ;;  %v1541_v7 = vld [vmem:[#allocation1 + $0x9] sm:$0xff]  ;;  %v1540_v11 = vld [vmem:[#allocation1] sm:$0xff]  ;;  %v1542_v12 = vld [vmem:[#allocation1 + $0x12] sm:$0xff] }
  0x63   :  { %v3569_v21 = vld [vmem:[%s4591_s2 + $0x160] sm:$0xff] }
  0x64   :  { %v3561_v23 = vld [vmem:[%s4591_s2 + $0x120] sm:$0xff] }
  0x65   :  { %1479 = vmatpush.bf16.msra.mxu0 %v3718_v24  ;;  %1505 = vmatpush.bf16.msra.mxu2 %v3734_v25  ;;  %v3577_v24 = vld [vmem:[%s4591_s2 + $0x1a0] sm:$0xff]  ;;  %v3552_v25 = vld [vmem:[%s4591_s2 + $0xd8] sm:$0xff] }
  0x66   :  { %1492 = vmatpush.bf16.msra.mxu1 %v3726_v26  ;;  %1518 = vmatpush.bf16.msra.mxu3 %v3742_v27  ;;  %v3568_v26 = vld [vmem:[%s4591_s2 + $0x158] sm:$0xff] }
  0x67   :  { %v3560_v27 = vld [vmem:[%s4591_s2 + $0x118] sm:$0xff] }
  0x69   :  { %1480 = vmatpush.bf16.msra.mxu0 %v3717_v28  ;;  %1506 = vmatpush.bf16.msra.mxu2 %v3733_v29  ;;  %v3576_v28 = vld [vmem:[%s4591_s2 + $0x198] sm:$0xff]  ;;  %v3551_v29 = vld [vmem:[%s4591_s2 + $0xd0] sm:$0xff] }
  0x6a   :  { %1493 = vmatpush.bf16.msra.mxu1 %v3725_v32  ;;  %1519 = vmatpush.bf16.msra.mxu3 %v3741_v33  ;;  %v3575_v32 = vld [vmem:[%s4591_s2 + $0x190] sm:$0xff]  ;;  %v3550_v33 = vld [vmem:[%s4591_s2 + $0xc8] sm:$0xff] }
  0x6c   :  { %1481 = vmatmul.bf16.vlgmr.msra.gmra.mxu0 %v727_v35  ;;  %1507 = vmatmul.bf16.vlgmr.msra.gmra.mxu2 %v729_v36  ;;  %v3558_v35 = vld [vmem:[%s4591_s2 + $0x108] sm:$0xff] }
  0x6d   :  { %1525 = vmatpush.bf16.msrb.mxu0 %v3756_v30  ;;  %2355 = vmatpush.bf16.msrb.mxu2 %v3540_v31  ;;  %v3567_v30 = vld [vmem:[%s4591_s2 + $0x150] sm:$0xff]  ;;  %v3574_v36 = vld [vmem:[%s4591_s2 + $0x188] sm:$0xff] }
  0x6e   :  { %2342 = vmatpush.bf16.msrb.mxu1 %v3532_v34  ;;  %2368 = vmatpush.bf16.msrb.mxu3 %v3548_v37  ;;  %v3559_v31 = vld [vmem:[%s4591_s2 + $0x110] sm:$0xff]  ;;  %v3566_v34 = vld [vmem:[%s4591_s2 + $0x148] sm:$0xff]  ;;  %v3549_v37 = vld [vmem:[%s4591_s2 + $0xc0] sm:$0xff] }
  0x6f   :  { %1494 = vmatmul.bf16.vlgmr.msra.gmra.mxu1 %v728_v38  ;;  %1520 = vmatmul.bf16.vlgmr.msra.gmra.mxu3 %v730_v39  ;;  %v3565_v38 = vld [vmem:[%s4591_s2 + $0x140] sm:$0xff]  ;;  %v3588_v39 = vld [vmem:[%s4591_s2 + $0x1f8] sm:$0xff] }
  0x71   :  { %1526 = vmatpush.bf16.msrb.mxu0 %v3755_v41  ;;  %2356 = vmatpush.bf16.msrb.mxu2 %v3539_v42  ;;  %v3557_v41 = vld [vmem:[%s4591_s2 + $0x100] sm:$0xff] }
  0x72   :  { %2343 = vmatpush.bf16.msrb.mxu1 %v3531_v43  ;;  %2369 = vmatpush.bf16.msrb.mxu3 %v3547_v22  ;;  %v3573_v42 = vld [vmem:[%s4591_s2 + $0x180] sm:$0xff]  ;;  %v1545_v22 = vld [vmem:[#allocation1 + $0x2d] sm:$0xff] }
  0x73   :  { %v1543_v43 = vld [vmem:[#allocation1 + $0x1b] sm:$0xff] }
  0x75   :  { %1527 = vmatpush.bf16.msrb.mxu0 %v3754_v44  ;;  %2357 = vmatpush.bf16.msrb.mxu2 %v3538_v45  ;;  %v1544_v44 = vld [vmem:[#allocation1 + $0x24] sm:$0xff]  ;;  %v1546_v45 = vld [vmem:[#allocation1 + $0x36] sm:$0xff] }
  0x76   :  { %2344 = vmatpush.bf16.msrb.mxu1 %v3530_v46  ;;  %2370 = vmatpush.bf16.msrb.mxu3 %v3546_v47  ;;  %v4366_v46 = vld [vmem:[#allocation1 + $0x3f] sm:$0xff] }
  0x77   :  { %v3596_v47 = vld [vmem:[%s4591_s2 + $0x238] sm:$0xff]  ;;  %1549 = vst [vmem:[#allocation1] ss:$9 sm:$0xff] %v4020_v61  ;;  %v3595_v61 = vld [vmem:[%s4591_s2 + $0x230] sm:$0xff] }
  0x79   :  { %1528 = vmatpush.bf16.msrb.mxu0 %v3753_v48  ;;  %2358 = vmatpush.bf16.msrb.mxu2 %v3537_v49  ;;  %v3612_v48 = vld [vmem:[%s4591_s2 + $0x2b8] sm:$0xff]  ;;  %v3587_v49 = vld [vmem:[%s4591_s2 + $0x1f0] sm:$0xff] }
  0x7a   :  { %2345 = vmatpush.bf16.msrb.mxu1 %v3529_v50  ;;  %2371 = vmatpush.bf16.msrb.mxu3 %v3545_v51  ;;  %v3603_v50 = vld [vmem:[%s4591_s2 + $0x270] sm:$0xff] }
  0x7b   :  { %v3611_v51 = vld [vmem:[%s4591_s2 + $0x2b0] sm:$0xff] }
  0x7d   :  { %1529 = vmatpush.bf16.msrb.mxu0 %v3752_v52  ;;  %2359 = vmatpush.bf16.msrb.mxu2 %v3536_v53  ;;  %v3586_v52 = vld [vmem:[%s4591_s2 + $0x1e8] sm:$0xff] }
  0x7e   :  { %2346 = vmatpush.bf16.msrb.mxu1 %v3528_v54  ;;  %2372 = vmatpush.bf16.msrb.mxu3 %v3544_v55  ;;  %v3602_v53 = vld [vmem:[%s4591_s2 + $0x268] sm:$0xff] }
  0x7f   :  { %v3594_v54 = vld [vmem:[%s4591_s2 + $0x228] sm:$0xff] }
  0x80   :  { %v3610_v55 = vld [vmem:[%s4591_s2 + $0x2a8] sm:$0xff] }
  0x81   :  { %1530 = vmatpush.bf16.msrb.mxu0 %v3751_v56  ;;  %2360 = vmatpush.bf16.msrb.mxu2 %v3535_v57  ;;  %v3585_v56 = vld [vmem:[%s4591_s2 + $0x1e0] sm:$0xff] }
  0x82   :  { %2347 = vmatpush.bf16.msrb.mxu1 %v3527_v58  ;;  %2373 = vmatpush.bf16.msrb.mxu3 %v3543_v59  ;;  %v3601_v57 = vld [vmem:[%s4591_s2 + $0x260] sm:$0xff] }
  0x83   :  { %v3593_v58 = vld [vmem:[%s4591_s2 + $0x220] sm:$0xff] }
  0x84   :  { %v3609_v59 = vld [vmem:[%s4591_s2 + $0x2a0] sm:$0xff] }
  0x85   :  { %1531 = vmatpush.bf16.msrb.mxu0 %v3750_v60  ;;  %2361 = vmatpush.bf16.msrb.mxu2 %v3534_v62  ;;  %v3584_v60 = vld [vmem:[%s4591_s2 + $0x1d8] sm:$0xff] }
  0x86   :  { %2348 = vmatpush.bf16.msrb.mxu1 %v3526_v63  ;;  %2374 = vmatpush.bf16.msrb.mxu3 %v3542_v0  ;;  %v3600_v62 = vld [vmem:[%s4591_s2 + $0x258] sm:$0xff] }
  0x87   :  { %v3592_v63 = vld [vmem:[%s4591_s2 + $0x218] sm:$0xff] }
  0x88   :  { %v3608_v0 = vld [vmem:[%s4591_s2 + $0x298] sm:$0xff] }
  0x89   :  { %1532 = vmatpush.bf16.msrb.mxu0 %v3749_v1  ;;  %2362 = vmatpush.bf16.msrb.mxu2 %v3533_v2  ;;  %v3583_v1 = vld [vmem:[%s4591_s2 + $0x1d0] sm:$0xff] }
  0x8a   :  { %2349 = vmatpush.bf16.msrb.mxu1 %v3525_v5  ;;  %2375 = vmatpush.bf16.msrb.mxu3 %v3541_v6  ;;  %v3599_v2 = vld [vmem:[%s4591_s2 + $0x250] sm:$0xff]  ;;  %v3582_v5 = vld [vmem:[%s4591_s2 + $0x1c8] sm:$0xff] }
  0x8b   :  { %v3598_v6 = vld [vmem:[%s4591_s2 + $0x248] sm:$0xff] }
  0x8c   :  { %1533 = vmatmul.bf16.vlgmr.msrb.gmra.mxu0 %v4176_v40  ;;  %2363 = vmatmul.bf16.vlgmr.msrb.gmra.mxu2 %v1541_v7  ;;  %v3604_v40 = vld [vmem:[%s4591_s2 + $0x278] sm:$0xff]  ;;  %v3590_v7 = vld [vmem:[%s4591_s2 + $0x208] sm:$0xff] }
  0x8d   :  { %2381 = vmatpush.bf16.msra.mxu0 %v3556_v3  ;;  %2407 = vmatpush.bf16.msra.mxu2 %v3572_v4  ;;  %v3591_v3 = vld [vmem:[%s4591_s2 + $0x210] sm:$0xff] }
  0x8e   :  { %2394 = vmatpush.bf16.msra.mxu1 %v3564_v8  ;;  %2420 = vmatpush.bf16.msra.mxu3 %v3580_v9  ;;  %v3607_v4 = vld [vmem:[%s4591_s2 + $0x290] sm:$0xff]  ;;  %v3606_v8 = vld [vmem:[%s4591_s2 + $0x288] sm:$0xff]  ;;  %v3581_v9 = vld [vmem:[%s4591_s2 + $0x1c0] sm:$0xff] }
  0x8f   :  { %2350 = vmatmul.bf16.vlgmr.msrb.gmra.mxu1 %v1540_v11  ;;  %2376 = vmatmul.bf16.vlgmr.msrb.gmra.mxu3 %v1542_v12  ;;  %v3620_v11 = vld [vmem:[%s4591_s2 + $0x2f8] sm:$0xff] }
  0x90   :  { %v3636_v12 = vld [vmem:[%s4591_s2 + $0x378] sm:$0xff] }
  0x91   :  { %2382 = vmatpush.bf16.msra.mxu0 %v3555_v10  ;;  %2408 = vmatpush.bf16.msra.mxu2 %v3571_v13  ;;  %v3597_v10 = vld [vmem:[%s4591_s2 + $0x240] sm:$0xff] }
  0x92   :  { %2395 = vmatpush.bf16.msra.mxu1 %v3563_v14  ;;  %2421 = vmatpush.bf16.msra.mxu3 %v3579_v15  ;;  %v3589_v13 = vld [vmem:[%s4591_s2 + $0x200] sm:$0xff]  ;;  %v1551_v15 = vld [vmem:[#allocation1 + $0x9] sm:$0xff] }
  0x93   :  { %v3605_v14 = vld [vmem:[%s4591_s2 + $0x280] sm:$0xff] }
  0x95   :  { %2383 = vmatpush.bf16.msra.mxu0 %v3554_v16  ;;  %2409 = vmatpush.bf16.msra.mxu2 %v3570_v17  ;;  %v3628_v16 = vld [vmem:[%s4591_s2 + $0x338] sm:$0xff] }
  0x96   :  { %2396 = vmatpush.bf16.msra.mxu1 %v3562_v18  ;;  %2422 = vmatpush.bf16.msra.mxu3 %v3578_v19  ;;  %v3644_v17 = vld [vmem:[%s4591_s2 + $0x3b8] sm:$0xff]  ;;  %v3619_v18 = vld [vmem:[%s4591_s2 + $0x2f0] sm:$0xff]  ;;  %v1550_v19 = vld [vmem:[#allocation1] sm:$0xff] }
  0x99   :  { %2384 = vmatpush.bf16.msra.mxu0 %v3553_v20  ;;  %2410 = vmatpush.bf16.msra.mxu2 %v3569_v21  ;;  %v1552_v20 = vld [vmem:[#allocation1 + $0x12] sm:$0xff] }
  0x9a   :  { %2397 = vmatpush.bf16.msra.mxu1 %v3561_v23  ;;  %2423 = vmatpush.bf16.msra.mxu3 %v3577_v24  ;;  %v3635_v21 = vld [vmem:[%s4591_s2 + $0x370] sm:$0xff] }
  0x9b   :  { %v3627_v23 = vld [vmem:[%s4591_s2 + $0x330] sm:$0xff] }
  0x9c   :  { %v3643_v24 = vld [vmem:[%s4591_s2 + $0x3b0] sm:$0xff] }
  0x9d   :  { %2385 = vmatpush.bf16.msra.mxu0 %v3552_v25  ;;  %2411 = vmatpush.bf16.msra.mxu2 %v3568_v26 }
  0x9e   :  { %2398 = vmatpush.bf16.msra.mxu1 %v3560_v27  ;;  %2424 = vmatpush.bf16.msra.mxu3 %v3576_v28  ;;  %v3618_v27 = vld [vmem:[%s4591_s2 + $0x2e8] sm:$0xff] }
  0x9f   :  { %v3634_v28 = vld [vmem:[%s4591_s2 + $0x368] sm:$0xff] }
  0xa1   :  { %2386 = vmatpush.bf16.msra.mxu0 %v3551_v29  ;;  %2412 = vmatpush.bf16.msra.mxu2 %v3567_v30  ;;  %v3626_v30 = vld [vmem:[%s4591_s2 + $0x328] sm:$0xff] }
  0xa2   :  { %2399 = vmatpush.bf16.msra.mxu1 %v3559_v31  ;;  %2425 = vmatpush.bf16.msra.mxu3 %v3575_v32  ;;  %v3642_v31 = vld [vmem:[%s4591_s2 + $0x3a8] sm:$0xff]  ;;  %v3617_v32 = vld [vmem:[%s4591_s2 + $0x2e0] sm:$0xff] }
  0xa5   :  { %2387 = vmatpush.bf16.msra.mxu0 %v3550_v33  ;;  %2413 = vmatpush.bf16.msra.mxu2 %v3566_v34  ;;  %v3633_v33 = vld [vmem:[%s4591_s2 + $0x360] sm:$0xff] }
  0xa6   :  { %2400 = vmatpush.bf16.msra.mxu1 %v3558_v35  ;;  %2426 = vmatpush.bf16.msra.mxu3 %v3574_v36 }
  0xa9   :  { %2388 = vmatpush.bf16.msra.mxu0 %v3549_v37  ;;  %2414 = vmatpush.bf16.msra.mxu2 %v3565_v38  ;;  %v3625_v37 = vld [vmem:[%s4591_s2 + $0x320] sm:$0xff] }
  0xaa   :  { %2401 = vmatpush.bf16.msra.mxu1 %v3557_v41  ;;  %2427 = vmatpush.bf16.msra.mxu3 %v3573_v42  ;;  %v3641_v38 = vld [vmem:[%s4591_s2 + $0x3a0] sm:$0xff]  ;;  %v3616_v42 = vld [vmem:[%s4591_s2 + $0x2d8] sm:$0xff] }
  0xac   :  { %2389 = vmatmul.bf16.vlgmr.msra.gmra.mxu0 %v1543_v43  ;;  %2415 = vmatmul.bf16.vlgmr.msra.gmra.mxu2 %v1545_v22  ;;  %v3632_v43 = vld [vmem:[%s4591_s2 + $0x358] sm:$0xff] }
  0xad   :  { %2433 = vmatpush.bf16.msrb.mxu0 %v3588_v39  ;;  %2459 = vmatpush.bf16.msrb.mxu2 %v3604_v40  ;;  %v3624_v22 = vld [vmem:[%s4591_s2 + $0x318] sm:$0xff] }
  0xae   :  { %2446 = vmatpush.bf16.msrb.mxu1 %v3596_v47  ;;  %2472 = vmatpush.bf16.msrb.mxu3 %v3612_v48 }
  0xaf   :  { %2402 = vmatmul.bf16.vlgmr.msra.gmra.mxu1 %v1544_v44  ;;  %2428 = vmatmul.bf16.vlgmr.msra.gmra.mxu3 %v1546_v45  ;;  %v3640_v44 = vld [vmem:[%s4591_s2 + $0x398] sm:$0xff]  ;;  %v3615_v45 = vld [vmem:[%s4591_s2 + $0x2d0] sm:$0xff] }
  0xb1   :  { %2434 = vmatpush.bf16.msrb.mxu0 %v3587_v49  ;;  %2460 = vmatpush.bf16.msrb.mxu2 %v3603_v50  ;;  %v3623_v49 = vld [vmem:[%s4591_s2 + $0x310] sm:$0xff] }
  0xb2   :  { %2447 = vmatpush.bf16.msrb.mxu1 %v3595_v61  ;;  %2473 = vmatpush.bf16.msrb.mxu3 %v3611_v51  ;;  %v3639_v50 = vld [vmem:[%s4591_s2 + $0x390] sm:$0xff] }
  0xb5   :  { %2435 = vmatpush.bf16.msrb.mxu0 %v3586_v52  ;;  %2461 = vmatpush.bf16.msrb.mxu2 %v3602_v53  ;;  %v3614_v53 = vld [vmem:[%s4591_s2 + $0x2c8] sm:$0xff] }
  0xb6   :  { %2448 = vmatpush.bf16.msrb.mxu1 %v3594_v54  ;;  %2474 = vmatpush.bf16.msrb.mxu3 %v3610_v55  ;;  %v3630_v54 = vld [vmem:[%s4591_s2 + $0x348] sm:$0xff] }
  0xb9   :  { %2436 = vmatpush.bf16.msrb.mxu0 %v3585_v56  ;;  %2462 = vmatpush.bf16.msrb.mxu2 %v3601_v57  ;;  %v3622_v56 = vld [vmem:[%s4591_s2 + $0x308] sm:$0xff] }
  0xba   :  { %2449 = vmatpush.bf16.msrb.mxu1 %v3593_v58  ;;  %2475 = vmatpush.bf16.msrb.mxu3 %v3609_v59  ;;  %v3638_v57 = vld [vmem:[%s4591_s2 + $0x388] sm:$0xff]  ;;  %v3613_v58 = vld [vmem:[%s4591_s2 + $0x2c0] sm:$0xff] }
  0xbb   :  { %v3629_v59 = vld [vmem:[%s4591_s2 + $0x340] sm:$0xff] }
  0xbd   :  { %2437 = vmatpush.bf16.msrb.mxu0 %v3584_v60  ;;  %2463 = vmatpush.bf16.msrb.mxu2 %v3600_v62  ;;  %v3652_v62 = vld [vmem:[%s4591_s2 + $0x3f8] sm:$0xff] }
  0xbe   :  { %2450 = vmatpush.bf16.msrb.mxu1 %v3592_v63  ;;  %2476 = vmatpush.bf16.msrb.mxu3 %v3608_v0 }
  0xc1   :  { %2438 = vmatpush.bf16.msrb.mxu0 %v3583_v1  ;;  %2464 = vmatpush.bf16.msrb.mxu2 %v3599_v2  ;;  %v3621_v1 = vld [vmem:[%s4591_s2 + $0x300] sm:$0xff] }
  0xc2   :  { %2451 = vmatpush.bf16.msrb.mxu1 %v3591_v3  ;;  %2477 = vmatpush.bf16.msrb.mxu3 %v3607_v4  ;;  %v3637_v2 = vld [vmem:[%s4591_s2 + $0x380] sm:$0xff] }
  0xc5   :  { %2439 = vmatpush.bf16.msrb.mxu0 %v3582_v5  ;;  %2465 = vmatpush.bf16.msrb.mxu2 %v3598_v6  ;;  %v1553_v5 = vld [vmem:[#allocation1 + $0x1b] sm:$0xff]  ;;  %v1555_v6 = vld [vmem:[#allocation1 + $0x2d] sm:$0xff] }
  0xc6   :  { %2452 = vmatpush.bf16.msrb.mxu1 %v3590_v7  ;;  %2478 = vmatpush.bf16.msrb.mxu3 %v3606_v8  ;;  %v1554_v8 = vld [vmem:[#allocation1 + $0x24] sm:$0xff] }
  0xc8   :  { %v1378_v25 = vpop.f32.mrf.mxu0 }
  0xc9   :  { %2440 = vmatpush.bf16.msrb.mxu0 %v3581_v9  ;;  %2466 = vmatpush.bf16.msrb.mxu2 %v3597_v10  ;;  %v1391_v26 = vpop.f32.mrf.mxu1  ;;  %v1556_v9 = vld [vmem:[#allocation1 + $0x36] sm:$0xff] }
  0xca   :  { %2453 = vmatpush.bf16.msrb.mxu1 %v3589_v13  ;;  %2479 = vmatpush.bf16.msrb.mxu3 %v3605_v14  ;;  %v1392_v29 = vadd.f32 %v1391_v26, %v1378_v25  ;;  %v3651_v10 = vld [vmem:[%s4591_s2 + $0x3f0] sm:$0xff] }
  0xcb   :  { %v3647_v26 = vld [vmem:[%s4591_s2 + $0x3d0] sm:$0xff] }
  0xcc   :  { %2441 = vmatmul.bf16.vlgmr.msrb.gmra.mxu0 %v4366_v46  ;;  %2467 = vmatmul.bf16.vlgmr.msrb.gmra.mxu2 %v1551_v15  ;;  %v3631_v46 = vld [vmem:[%s4591_s2 + $0x350] sm:$0xff] }
  0xcd   :  { %2485 = vmatpush.bf16.msra.mxu0 %v3620_v11  ;;  %2511 = vmatpush.bf16.msra.mxu2 %v3636_v12  ;;  %v3650_v12 = vld [vmem:[%s4591_s2 + $0x3e8] sm:$0xff] }
  0xce   :  { %2498 = vmatpush.bf16.msra.mxu1 %v3628_v16  ;;  %2524 = vmatpush.bf16.msra.mxu3 %v3644_v17  ;;  %v1404_v34 = vpop.f32.mrf.mxu2  ;;  %v3649_v16 = vld [vmem:[%s4591_s2 + $0x3e0] sm:$0xff] }
  0xcf   :  { %2454 = vmatmul.bf16.vlgmr.msrb.gmra.mxu1 %v1550_v19  ;;  %2480 = vmatmul.bf16.vlgmr.msrb.gmra.mxu3 %v1552_v20  ;;  %v1405_v35 = vadd.f32 %v1404_v34, %v1392_v29  ;;  %v1417_v36 = vpop.f32.mrf.mxu3  ;;  %v3648_v19 = vld [vmem:[%s4591_s2 + $0x3d8] sm:$0xff] }
  0xd0   :  { %v1380_v39 = vpop.f32.mrf.mxu0 }
  0xd1   :  { %2486 = vmatpush.bf16.msra.mxu0 %v3619_v18  ;;  %2512 = vmatpush.bf16.msra.mxu2 %v3635_v21  ;;  %v1418_v40 = vadd.f32 %v1417_v36, %v1405_v35  ;;  %v1393_v41 = vpop.f32.mrf.mxu1 }
  0xd2   :  { %2499 = vmatpush.bf16.msra.mxu1 %v3627_v23  ;;  %2525 = vmatpush.bf16.msra.mxu3 %v3643_v24 }
  0xd5   :  { %2487 = vmatpush.bf16.msra.mxu0 %v3618_v27  ;;  %2513 = vmatpush.bf16.msra.mxu2 %v3634_v28  ;;  %v3646_v28 = vld [vmem:[%s4591_s2 + $0x3c8] sm:$0xff] }
  0xd6   :  { %2500 = vmatpush.bf16.msra.mxu1 %v3626_v30  ;;  %2526 = vmatpush.bf16.msra.mxu3 %v3642_v31  ;;  %v1406_v47 = vpop.f32.mrf.mxu2  ;;  %v3645_v31 = vld [vmem:[%s4591_s2 + $0x3c0] sm:$0xff] }
  0xd7   :  { %v1419_v48 = vpop.f32.mrf.mxu3 }
  0xd8   :  { %v1430_v61 = vpop.f32.mrf.mxu0 }
  0xd9   :  { %2488 = vmatpush.bf16.msra.mxu0 %v3617_v32  ;;  %2514 = vmatpush.bf16.msra.mxu2 %v3633_v33  ;;  %v1431_v51 = vadd.f32 %v1430_v61, %v1418_v40  ;;  %v1443_v52 = vpop.f32.mrf.mxu1  ;;  %v1557_v32 = vld [vmem:[#allocation1 + $0x3f] sm:$0xff] }
  0xda   :  { %2501 = vmatpush.bf16.msra.mxu1 %v3625_v37  ;;  %2527 = vmatpush.bf16.msra.mxu3 %v3641_v38 }
  0xdb   :  { %v1444_v55 = vadd.f32 %v1443_v52, %v1431_v51 }
  0xdd   :  { %2489 = vmatpush.bf16.msra.mxu0 %v3616_v42  ;;  %2515 = vmatpush.bf16.msra.mxu2 %v3632_v43 }
  0xde   :  { %2502 = vmatpush.bf16.msra.mxu1 %v3624_v22  ;;  %2528 = vmatpush.bf16.msra.mxu3 %v3640_v44  ;;  %v1456_v60 = vpop.f32.mrf.mxu2 }
  0xdf   :  { %v1457_v63 = vadd.f32 %v1456_v60, %v1444_v55  ;;  %v1469_v0 = vpop.f32.mrf.mxu3 }
  0xe0   :  { %v1432_v3 = vpop.f32.mrf.mxu0 }
  0xe1   :  { %2490 = vmatpush.bf16.msra.mxu0 %v3615_v45  ;;  %2516 = vmatpush.bf16.msra.mxu2 %v3631_v46  ;;  %v1470_v4 = vadd.f32 %v1469_v0, %v1457_v63  ;;  %v1445_v7 = vpop.f32.mrf.mxu1 }
  0xe2   :  { %2503 = vmatpush.bf16.msra.mxu1 %v3623_v49  ;;  %2529 = vmatpush.bf16.msra.mxu3 %v3639_v50 }
  0xe5   :  { %2491 = vmatpush.bf16.msra.mxu0 %v3614_v53  ;;  %2517 = vmatpush.bf16.msra.mxu2 %v3630_v54 }
  0xe6   :  { %2504 = vmatpush.bf16.msra.mxu1 %v3622_v56  ;;  %2530 = vmatpush.bf16.msra.mxu3 %v3638_v57  ;;  %v1458_v11 = vpop.f32.mrf.mxu2 }
  0xe7   :  { %v1471_v13 = vpop.f32.mrf.mxu3 }
  0xe9   :  { %2492 = vmatpush.bf16.msra.mxu0 %v3613_v58  ;;  %2518 = vmatpush.bf16.msra.mxu2 %v3629_v59  ;;  %v1482_v14 = vpop.f32.mrf.mxu0 }
  0xea   :  { %2505 = vmatpush.bf16.msra.mxu1 %v3621_v1  ;;  %2531 = vmatpush.bf16.msra.mxu3 %v3637_v2  ;;  %v1483_v15 = vadd.f32 %v1482_v14, %v1470_v4 }
  0xec   :  { %2493 = vmatmul.bf16.vlgmr.msra.gmra.mxu0 %v1553_v5  ;;  %2519 = vmatmul.bf16.vlgmr.msra.gmra.mxu2 %v1555_v6  ;;  %v1495_v17 = vpop.f32.mrf.mxu1 }
  0xed   :  { %2537 = vmatpush.bf16.msrb.mxu0 %v3652_v62  ;;  %2506 = vmatmul.bf16.vlgmr.msra.gmra.mxu1 %v1554_v8  ;;  %v1496_v18 = vadd.f32 %v1495_v17, %v1483_v15 }
  0xee   :  { %2532 = vmatmul.bf16.vlgmr.msra.gmra.mxu3 %v1556_v9 }
  0xef   :  { %v1508_v20 = vpop.f32.mrf.mxu2 }
  0xf0   :  { %v1509_v21 = vadd.f32 %v1508_v20, %v1496_v18 }
  0xf1   :  { %2538 = vmatpush.bf16.msrb.mxu0 %v3651_v10  ;;  %v1484_v24 = vpop.f32.mrf.mxu0 }
  0xf2   :  { %v1521_v23 = vpop.f32.mrf.mxu3 }
  0xf3   :  { %v1522_v25 = vadd.f32 %v1521_v23, %v1509_v21 }
  0xf4   :  { %v1497_v27 = vpop.f32.mrf.mxu1 }
  0xf5   :  { %2539 = vmatpush.bf16.msrb.mxu0 %v3650_v12 }
  0xf7   :  { %v1510_v29 = vpop.f32.mrf.mxu2 }
  0xf9   :  { %2540 = vmatpush.bf16.msrb.mxu0 %v3649_v16  ;;  %v3758_v16 = vld [vmem:[%s4593_s4] ss:$0 sm:$0xff]  ;;  %s3789_s4 = smov [#allocation2]  }
  0xfa   :  { %v1523_v30 = vpop.f32.mrf.mxu3  ;;  %s2586_s18 = sshll.u32 %s3789_s4, 4  ;;  %s2587_s18 = int_to_ptr.vmem [resolvable:$true] %s2586_s18 }
  0xfd   :  { %2541 = vmatpush.bf16.msrb.mxu0 %v3648_v19 }
 0x101   :  { %2542 = vmatpush.bf16.msrb.mxu0 %v3647_v26 }
 0x105   :  { %2543 = vmatpush.bf16.msrb.mxu0 %v3646_v28 }
 0x109   :  { %2544 = vmatpush.bf16.msrb.mxu0 %v3645_v31  ;;  %v1534_v33 = vpop.f32.mrf.mxu0 }
 0x10a   :  { %v1535_v34 = vadd.f32 %v1534_v33, %v1522_v25 }
 0x10c   :  { %2545 = vmatmul.bf16.vlgmr.msrb.gmra.mxu0 %v1557_v32  ;;  %v2351_v35 = vpop.f32.mrf.mxu1 }
 0x10d   :  { %v2352_v36 = vadd.f32 %v2351_v35, %v1535_v34 }
 0x10f   :  { %v2364_v37 = vpop.f32.mrf.mxu2 }
 0x110   :  { %v2365_v38 = vadd.f32 %v2364_v37, %v2352_v36 }
 0x111   :  { %v1536_v40 = vpop.f32.mrf.mxu0 }
 0x112   :  { %v2377_v39 = vpop.f32.mrf.mxu3 }
 0x113   :  { %v2378_v41 = vadd.f32 %v2377_v39, %v2365_v38 }
 0x114   :  { %v2353_v42 = vpop.f32.mrf.mxu1 }
 0x117   :  { %v2366_v43 = vpop.f32.mrf.mxu2 }
 0x11a   :  { %v2379_v22 = vpop.f32.mrf.mxu3 }
 0x129   :  { %v2390_v44 = vpop.f32.mrf.mxu0 }
 0x12a   :  { %v2391_v45 = vadd.f32 %v2390_v44, %v2378_v41 }
 0x12c   :  { %v2403_v46 = vpop.f32.mrf.mxu1 }
 0x12d   :  { %v2404_v47 = vadd.f32 %v2403_v46, %v2391_v45 }
 0x12f   :  { %v2416_v48 = vpop.f32.mrf.mxu2 }
 0x130   :  { %v2417_v49 = vadd.f32 %v2416_v48, %v2404_v47 }
 0x131   :  { %v2392_v61 = vpop.f32.mrf.mxu0 }
 0x132   :  { %v2429_v50 = vpop.f32.mrf.mxu3 }
 0x133   :  { %v2430_v51 = vadd.f32 %v2429_v50, %v2417_v49 }
 0x134   :  { %v2405_v52 = vpop.f32.mrf.mxu1 }
 0x137   :  { %v2418_v53 = vpop.f32.mrf.mxu2 }
 0x13a   :  { %v2431_v54 = vpop.f32.mrf.mxu3 }
 0x149   :  { %v2442_v55 = vpop.f32.mrf.mxu0 }
 0x14a   :  { %v2443_v3 = vadd.f32 %v2442_v55, %v2430_v51 }
 0x14c   :  { %v2455_v56 = vpop.f32.mrf.mxu1 }
 0x14d   :  { %v2456_v7 = vadd.f32 %v2455_v56, %v2443_v3 }
 0x14f   :  { %v2468_v57 = vpop.f32.mrf.mxu2 }
 0x150   :  { %v2469_v8 = vadd.f32 %v2468_v57, %v2456_v7 }
 0x151   :  { %v2444_v59 = vpop.f32.mrf.mxu0 }
 0x152   :  { %v2481_v58 = vpop.f32.mrf.mxu3 }
 0x153   :  { %v2482_v11 = vadd.f32 %v2481_v58, %v2469_v8 }
 0x154   :  { %v2457_v60 = vpop.f32.mrf.mxu1 }
 0x157   :  { %v2470_v62 = vpop.f32.mrf.mxu2 }
 0x15a   :  { %v2483_v63 = vpop.f32.mrf.mxu3 }
 0x169   :  { %v2494_v0 = vpop.f32.mrf.mxu0 }
 0x16a   :  { %v2507_v1 = vpop.f32.mrf.mxu1  ;;  %v2495_v12 = vadd.f32 %v2494_v0, %v2482_v11 }
 0x16c   :  { %v2508_v13 = vadd.f32 %v2507_v1, %v2495_v12 }
 0x16f   :  { %v2520_v2 = vpop.f32.mrf.mxu2 }
 0x170   :  { %v2521_v14 = vadd.f32 %v2520_v2, %v2508_v13 }
 0x171   :  { %v2533_v4 = vpop.f32.mrf.mxu3  ;;  %v2496_v5 = vpop.f32.mrf.mxu0 }
 0x172   :  { %v2509_v6 = vpop.f32.mrf.mxu1  ;;  %v2534_v15 = vadd.f32 %v2533_v4, %v2521_v14 }
 0x177   :  { %v2522_v9 = vpop.f32.mrf.mxu2 }
 0x179   :  { %v2535_v10 = vpop.f32.mrf.mxu3 }
 0x189   :  { %v2546_v17 = vpop.f32.mrf.mxu0 }
 0x18a   :  { %v2547_v18 = vadd.f32 %v2546_v17, %v2534_v15 }
 0x18c   :  { %v2554_v19 = vadd.f32 %v3758_v16, %v2547_v18 }
 0x18e   :  { %v2556_v20 = vsel %vm2555_vm10, %v2554_v19, -inf }
 0x18f   :  { %2557 = vmax.xlane.f32.xlu0 %v2556_v20 }
 0x191   :  { %v2548_v21 = vpop.f32.mrf.mxu0 }
 0x202   :  { %v2558_v23 = vpop.xlane.xlu0 %2557 }
 0x203   :  { %v2559_v24 = vsub.f32 %v2554_v19, %v2558_v23 }
 0x205   :  { %v2560_v25 = vmul.f32 1.442695, %v2559_v24 }
 0x207   :  { %3759 = vpow2.f32 %v2560_v25 }
 0x20d   :  { %v3760_v26 = vpop.eup %3759 }
 0x20e   :  { %v2562_v27 = vsel %vm2555_vm10, %v3760_v26, 0.0 }
 0x20f   :  { %2563 = vadd.xlane.f32.xlu0 %v2562_v27 }
 0x282   :  { %v2564_v28 = vpop.xlane.xlu0 %2563 }
 0x283   :  { %3761 = vrcp.f32 %v2564_v28  ;;  %v2576_v32 = vand.u32 2147483648, %v2564_v28  ;;  %v2574_v34 = vand.u32 2147483647, %v2564_v28  ;;  %vm2570_vm12 = vweird.f32 %v2564_v28 }
 0x285   :  { %v2577_v36 = vor.u32 1.1754944e-38, %v2576_v32  ;;  %vm2575_vm14 = vcmp.eq.f32.partialorder %v2574_v34, 8.507059e+37 }
 0x289   :  { %v3762_v29 = vpop.eup %3761 }
 0x28a   :  { %v2566_v30 = vmul.f32 %v3762_v29, %v2564_v28  ;;  %vm2571_vm11 = vweird.f32 %v3762_v29 }
 0x28b   :  { %vm2572_vm13 = vmor %vm2570_vm12, %vm2571_vm11 }
 0x28c   :  { %v2567_v31 = vsub.f32 1.0, %v2566_v30 }
 0x28e   :  { %v2568_v33 = vmul.f32 %v3762_v29, %v2567_v31 }
 0x290   :  { %v2569_v35 = vadd.f32 %v3762_v29, %v2568_v33 }
 0x292   :  { %v2573_v37 = vsel %vm2572_vm13, %v3762_v29, %v2569_v35 }
 0x293   :  { %v2578_v38 = vsel %vm2575_vm14, %v2577_v36, %v2573_v37 }
 0x294   :  { %v2579_v39 = vmul.f32 %v3760_v26, %v2578_v38 }
 0x296   :  { %2580 = vst.msk [vmem:[#allocation2] sm:$0x3] %vm2555_vm10, %v2579_v39 }
 0x297   :  { %2591 = dma.vmem_to_hbm [thread:$0]  %s2587_s18, 32, %s2589_s21, [#allocation3]  }
 0x298   :  { %3787 = dma.done.wait [#allocation3], 32  }
 0x299   :  { %3788 = vsyncadd [#allocation3], 4294967264 }
 0x29a   :  { %2596 = vsyncpa [#allocation3], 1 }

</bundles_post_ra>
